<compile_context>
chip_gen: v7x
topology: tpu7x:2x2x1
jax: 0.10.0
libtpu: 0.0.40
codegen_flags: <defaults>
</compile_context>

<pallas_src>
import functools
import math

import numpy as np
import jax
import jax.numpy as jnp
from jax.experimental import pallas as pl
from jax.experimental.pallas import tpu as pltpu

_MIN_LANES = 128                      # vreg lane width
_MAX_LANES = 2048                     # widest lane dim we reshape to
_TARGET_TILE_BYTES = 4 * 1024 * 1024  # ~4 MiB per tile (2-8 MiB sweet spot)
_VMEM_LIMIT_BYTES = 48 * 1024 * 1024  # 4 MiB tile * 2 arrays * 2 bufs << 48 MiB


def _copy_kernel(x_ref, o_ref):
    o_ref[...] = x_ref[...]


def _cdiv(a, b):
    return -(-a // b)


def _round_up(a, b):
    return _cdiv(a, b) * b


def _sublane_multiple(dtype) -> int:
    # f32 -> 8, bf16 -> 16, int8/fp8 -> 32 (packed sublanes)
    itemsize = jnp.dtype(dtype).itemsize
    return max(8, 32 // max(1, itemsize))


def _copy_2d(x2d, *, alias_input: bool):
    """Tiled, pipelined copy of a lane-dense (rows, lanes) slab."""
    rows, lanes = x2d.shape
    dtype = x2d.dtype
    itemsize = jnp.dtype(dtype).itemsize
    sub = _sublane_multiple(dtype)

    # Row tile sized for ~_TARGET_TILE_BYTES, sublane-aligned.
    row_tile = max(sub, (_TARGET_TILE_BYTES // (lanes * itemsize)) // sub * sub)
    # If the whole slab would fit in one tile but can be split, split it so
    # the v7x megacore ("parallel" axis) gets at least two grid steps.
    if rows >= 2 * sub and rows <= row_tile:
        row_tile = _round_up(_cdiv(rows, 2), sub)
    row_tile = min(row_tile, rows)        # full-dim block is always legal

    grid = (pl.cdiv(rows, row_tile),)     # ragged last block is masked by Pallas

    return pl.pallas_call(
        _copy_kernel,
        grid=grid,
        in_specs=[pl.BlockSpec((row_tile, lanes), lambda i: (i, 0))],
        out_specs=pl.BlockSpec((row_tile, lanes), lambda i: (i, 0)),
        out_shape=jax.ShapeDtypeStruct((rows, lanes), dtype),
        input_output_aliases=({0: 0} if alias_input else {}),
        cost_estimate=pl.CostEstimate(
            flops=0,
            transcendentals=0,
            bytes_accessed=2 * rows * lanes * itemsize,
        ),
        compiler_params=pltpu.CompilerParams(
            dimension_semantics=("parallel",),   # megacore-shardable on v7x
            vmem_limit_bytes=_VMEM_LIMIT_BYTES,
        ),
    )(x2d)


def identity_pallas(x, *, alias_input: bool = False):
    """Identity (forward(x) = x) as a tiled, pipelined Pallas copy kernel.

    If `alias_input=True`, the pallas_call aliases its input buffer to the
    output (pair with donation at the jit boundary for a true in-place copy).
    """
    orig_shape, dtype = x.shape, x.dtype
    n = math.prod(orig_shape) if orig_shape else 1

    if n == 0:
        return x                                  # nothing to copy

    flat = x.reshape(-1)

    if n % _MIN_LANES == 0:
        # Fast path: no padding, no tail slice -> single HBM read + write.
        # Widen the lane dim to the largest multiple of 128 dividing n.
        lanes = _MIN_LANES
        while lanes * 2 <= _MAX_LANES and n % (lanes * 2) == 0:
            lanes *= 2
        out2d = _copy_2d(flat.reshape(n // lanes, lanes),
                         alias_input=alias_input)
        return out2d.reshape(orig_shape)

    # Ragged fallback: pad only up to the next lane multiple (< 128 elements);
    # rows stay ragged in the grid (no row padding), tail sliced off at the end.
    rows = _cdiv(n, _MIN_LANES)
    padded_n = rows * _MIN_LANES
    flat = jnp.pad(flat, (0, padded_n - n))
    out2d = _copy_2d(flat.reshape(rows, _MIN_LANES), alias_input=alias_input)
    return out2d.reshape(-1)[:n].reshape(orig_shape)


if __name__ == "__main__":
    key = jax.random.PRNGKey(0)
    k1, k2, k3 = jax.random.split(key, 3)

    # NCHW feature map, small shape consistent with the DLA backbone context.
    x = jax.random.normal(k1, (2, 4, 16, 16), jnp.float32)
    fwd = jax.jit(identity_pallas)
    y = jax.block_until_ready(fwd(x))
    assert y.shape == x.shape and y.dtype == x.dtype
    assert bool(jnp.all(y == x))                       # exact identity

    # Unaligned / ragged shape exercises the padded fallback path.
    x2 = jax.random.normal(k2, (2, 3, 7, 5), jnp.float32)
    y2 = jax.block_until_ready(jax.jit(identity_pallas)(x2))
    assert y2.shape == x2.shape and bool(jnp.all(y2 == x2))

    # Aliased (donated) variant: in-place identity, no second HBM buffer.
    x3 = jax.random.normal(k3, (4, 8, 16, 16), jnp.float32)
    x3_host = np.asarray(x3)                           # host-side reference
    fwd_inplace = jax.jit(functools.partial(identity_pallas, alias_input=True),
                          donate_argnums=0)
    y3 = jax.block_until_ready(fwd_inplace(x3))
    assert y3.shape == x3_host.shape and y3.dtype == jnp.float32
    assert np.array_equal(np.asarray(y3), x3_host)

    print("KERNEL_OK")
</pallas_src>

<mosaic_0001>
module attributes {stable_mosaic.version = 11 : i64} {
  func.func @_copy_kernel(%arg0: i32, %arg1: memref<1x2048xf32, #tpu.memory_space<vmem>>, %arg2: memref<1x2048xf32, #tpu.memory_space<vmem>>) attributes {dimension_semantics = [#tpu.dimension_semantics<parallel>], iteration_bounds = array<i64: 1>, scalar_prefetch = 0 : i64, scratch_operands = 0 : i64, tpu.core_type = #tpu.core_type<tc>, window_params = [{transform_indices = @transform_0, window_bounds = array<i64: 1, 2048>}, {transform_indices = @transform_1, window_bounds = array<i64: 1, 2048>}]} {
    %c0 = arith.constant 0 : index
    %c0_0 = arith.constant 0 : index
    %0 = vector.load %arg1[%c0, %c0_0] : memref<1x2048xf32, #tpu.memory_space<vmem>>, vector<1x2048xf32>
    %c0_1 = arith.constant 0 : index
    %c0_2 = arith.constant 0 : index
    %1 = vector.load %arg2[%c0_1, %c0_2] : memref<1x2048xf32, #tpu.memory_space<vmem>>, vector<1x2048xf32>
    tpu.vector_store %arg2[%c0_1, %c0_2], %0 {strides = array<i32>} : memref<1x2048xf32, #tpu.memory_space<vmem>>, vector<1x2048xf32>,
    return
  }
  func.func @transform_0(%arg0: i32) -> (i32, i32) {
    %c0_i32 = arith.constant 0 : i32
    %c0_i32_0 = arith.constant 0 : i32
    return %arg0, %c0_i32 : i32, i32
  }
  func.func @transform_1(%arg0: i32) -> (i32, i32) {
    %c0_i32 = arith.constant 0 : i32
    %c0_i32_0 = arith.constant 0 : i32
    return %arg0, %c0_i32 : i32, i32
  }
}

</mosaic_0001>

<bundles_post_ra>
// kernel: identity_pallas.1
= control target key start
LH: loop header
LB: loop body
LE: loop exit
PB: predicated region body
PF: predicated region fallthrough
CT: control target
= control target key end

     0   :  { %s38_s0 = inlined_call_operand.vmem [shape: f32[1,2048], index: 0, kind: input, shape index: {}]   ;;  %s39_s1 = inlined_call_operand.vmem [shape: f32[1,2048], index: 1, kind: output, shape index: {}]  }
   0x1   :  { %v8_v0 = vld [vmem:[%s38_s0] sm:$0xff]  ;;  %v9_v1 = vld [vmem:[%s38_s0 + $0x8] sm:$0xff] }
   0x2   :  { %10 = vst [vmem:[%s39_s1] sm:$0xff] %v8_v0  ;;  %11 = vst [vmem:[%s39_s1 + $0x8] sm:$0xff] %v9_v1 }

</bundles_post_ra>
